<compile_context>
chip_gen: v5e
topology: v5e:2x2
jax: 0.10.0
libtpu: 0.0.40
codegen_flags: <defaults>
</compile_context>

<pallas_src>
import functools

import jax
import jax.numpy as jnp
from jax.experimental import pallas as pl
from jax.experimental.pallas import tpu as pltpu

LANE = 128
_VMEM_LIMIT = 32 * 1024 * 1024      # safe scoped-VMEM ceiling on v5e / v6e / v7x
_TILE_BUDGET = 24 * 1024 * 1024     # what one stage's live tiles may use


def _round_up(x, m):
    return (x + m - 1) // m * m


def _row_tile(m, cin_p, cout_p, cap=1024):
    """Row-tile size from the VMEM budget: 2 double-buffered (in + out) row
    tiles plus the (also double-buffered) resident weight must fit."""
    fixed = 2 * 4 * cin_p * cout_p            # weight, double-buffered
    per_row = 2 * 4 * (cin_p + cout_p)        # in + out row, double-buffered
    tm = (_TILE_BUDGET - fixed) // per_row
    tm = max(8, min(cap, tm))
    tm = min(tm, _round_up(m, 8))
    return max(8, (tm // 8) * 8)


def _row_mask(z, m_total, tm):
    """Zero rows past the true row count (only used when tm does not divide m)."""
    row = pl.program_id(0) * tm + jax.lax.broadcasted_iota(jnp.int32, (tm, 1), 0)
    return jnp.where(row < m_total, z, 0.0)


# ---------------------------------------------------------------------------
# Kernel A: (prev-BN scale/shift -> ReLU) -> 1x1 conv + BN partial statistics.
# ---------------------------------------------------------------------------
def _pw_conv_stats_kernel(x_ref, s_ref, b_ref, w_ref, y_ref, st_ref,
                          *, m_total, tm):
    z = jnp.maximum(x_ref[...] * s_ref[...] + b_ref[...], 0.0)
    if m_total % tm:                           # static: ragged last tile only
        z = _row_mask(z, m_total, tm)
    y = jnp.dot(z, w_ref[...], preferred_element_type=jnp.float32)
    y_ref[...] = y.astype(y_ref.dtype)
    st_ref[0:1, 0:1, :] = jnp.sum(y, axis=0).reshape(1, 1, -1)
    st_ref[0:1, 1:2, :] = jnp.sum(y * y, axis=0).reshape(1, 1, -1)


def pointwise_conv_stats(x2d, scale, shift, w):
    m, cin_p = x2d.shape
    cout_p = w.shape[1]
    tm = _row_tile(m, cin_p, cout_p)
    grid = (pl.cdiv(m, tm),)
    kernel = functools.partial(_pw_conv_stats_kernel, m_total=m, tm=tm)
    return pl.pallas_call(
        kernel,
        grid=grid,
        in_specs=[
            pl.BlockSpec((tm, cin_p), lambda i: (i, 0)),
            pl.BlockSpec((1, cin_p), lambda i: (0, 0)),
            pl.BlockSpec((1, cin_p), lambda i: (0, 0)),
            pl.BlockSpec((cin_p, cout_p), lambda i: (0, 0)),
        ],
        out_specs=(
            pl.BlockSpec((tm, cout_p), lambda i: (i, 0)),
            pl.BlockSpec((1, 2, cout_p), lambda i: (i, 0, 0)),
        ),
        out_shape=(
            jax.ShapeDtypeStruct((m, cout_p), jnp.float32),
            jax.ShapeDtypeStruct((grid[0], 2, cout_p), jnp.float32),
        ),
        compiler_params=pltpu.CompilerParams(
            dimension_semantics=("parallel",),
            vmem_limit_bytes=_VMEM_LIMIT),
    )(x2d, scale, shift, w)


# ---------------------------------------------------------------------------
# Kernel B: (BN2 scale/shift -> ReLU) -> 1x1 conv with BN3 pre-folded into the
# weight and a fused bias.  This writes the widest tensor exactly once.
# ---------------------------------------------------------------------------
def _pw_conv_bias_kernel(x_ref, s_ref, b_ref, w_ref, bias_ref, y_ref,
                         *, m_total, tm):
    z = jnp.maximum(x_ref[...] * s_ref[...] + b_ref[...], 0.0)
    if m_total % tm:
        z = _row_mask(z, m_total, tm)
    y = jnp.dot(z, w_ref[...], preferred_element_type=jnp.float32) + bias_ref[...]
    y_ref[...] = y.astype(y_ref.dtype)


def pointwise_conv_bias(x2d, scale, shift, w, bias):
    m, cin_p = x2d.shape
    cout_p = w.shape[1]
    tm = _row_tile(m, cin_p, cout_p)
    grid = (pl.cdiv(m, tm),)
    kernel = functools.partial(_pw_conv_bias_kernel, m_total=m, tm=tm)
    return pl.pallas_call(
        kernel,
        grid=grid,
        in_specs=[
            pl.BlockSpec((tm, cin_p), lambda i: (i, 0)),
            pl.BlockSpec((1, cin_p), lambda i: (0, 0)),
            pl.BlockSpec((1, cin_p), lambda i: (0, 0)),
            pl.BlockSpec((cin_p, cout_p), lambda i: (0, 0)),
            pl.BlockSpec((1, cout_p), lambda i: (0, 0)),
        ],
        out_specs=pl.BlockSpec((tm, cout_p), lambda i: (i, 0)),
        out_shape=jax.ShapeDtypeStruct((m, cout_p), jnp.float32),
        compiler_params=pltpu.CompilerParams(
            dimension_semantics=("parallel",),
            vmem_limit_bytes=_VMEM_LIMIT),
    )(x2d, scale, shift, w, bias)


# ---------------------------------------------------------------------------
# Kernel C: per-tile statistics of z = relu(bn2(y2)) on the *narrow* tensor:
# sum(z) and the gram matrix z^T z, from which BN3's batch stats of y3 = z @ w3
# are derived exactly (mean = E[z] w3, E[y3^2]_j = w3_j^T E[z z^T] w3_j).
# ---------------------------------------------------------------------------
def _z_stats_kernel(x_ref, s_ref, b_ref, sz_ref, g_ref, *, m_total, tm):
    z = jnp.maximum(x_ref[...] * s_ref[...] + b_ref[...], 0.0)
    if m_total % tm:
        z = _row_mask(z, m_total, tm)
    sz_ref[0:1, 0:1, :] = jnp.sum(z, axis=0).reshape(1, 1, -1)
    g_ref[...] = jax.lax.dot_general(
        z, z, dimension_numbers=(((0,), (0,)), ((), ())),
        preferred_element_type=jnp.float32)[None]


def z_stats_stage(x2d, scale, shift):
    m, cp = x2d.shape
    tm = _row_tile(m, cp, cp)
    grid = (pl.cdiv(m, tm),)
    kernel = functools.partial(_z_stats_kernel, m_total=m, tm=tm)
    return pl.pallas_call(
        kernel,
        grid=grid,
        in_specs=[
            pl.BlockSpec((tm, cp), lambda i: (i, 0)),
            pl.BlockSpec((1, cp), lambda i: (0, 0)),
            pl.BlockSpec((1, cp), lambda i: (0, 0)),
        ],
        out_specs=(
            pl.BlockSpec((1, 1, cp), lambda i: (i, 0, 0)),
            pl.BlockSpec((1, cp, cp), lambda i: (i, 0, 0)),
        ),
        out_shape=(
            jax.ShapeDtypeStruct((grid[0], 1, cp), jnp.float32),
            jax.ShapeDtypeStruct((grid[0], cp, cp), jnp.float32),
        ),
        compiler_params=pltpu.CompilerParams(
            dimension_semantics=("parallel",),
            vmem_limit_bytes=_VMEM_LIMIT),
    )(x2d, scale, shift)


# ---------------------------------------------------------------------------
# Kernel D: fused (BN1 scale/shift -> ReLU) -> 3x3 conv (pad=1, stride) with
# in-kernel halo construction + per-image BN partial statistics.
# ---------------------------------------------------------------------------
def _conv3x3_kernel(x_ref, s_ref, b_ref, w_ref, y_ref, st_ref, xp_ref, acc_ref,
                    *, stride, h, w_sp, oh, ow):
    cp = xp_ref.shape[-1]
    hp, wp = xp_ref.shape[0], xp_ref.shape[1]

    # Zero only the 1-pixel border ring that the taps actually read (the
    # interior is fully overwritten below; sublane padding beyond w_sp+2 is
    # never read).  Re-zeroing each step keeps it correct under megacore
    # grid partitioning.
    zrow = jnp.zeros((1, wp, cp), jnp.float32)
    zcol = jnp.zeros((hp, 1, cp), jnp.float32)
    xp_ref[0:1, :, :] = zrow
    xp_ref[h + 1:h + 2, :, :] = zrow
    xp_ref[:, 0:1, :] = zcol
    xp_ref[:, w_sp + 1:w_sp + 2, :] = zcol

    # BN1 + ReLU fused into the input path; interior stored at offset (1, 1).
    scale = s_ref[...].reshape(1, 1, cp)
    shift = b_ref[...].reshape(1, 1, cp)
    z = jnp.maximum(x_ref[0] * scale + shift, 0.0)
    xp_ref[pl.ds(1, h), pl.ds(1, w_sp), :] = z

    # 3x3 conv: nine (rows, Cp) @ (Cp, Cout) MXU matmuls; the three kw taps of
    # each kh are summed in SSA, so the f32 accumulator sees 1 store + 2 RMWs.
    xp = xp_ref[...]
    for kh in range(3):
        part = None
        for kw in range(3):
            patch = jax.lax.slice(
                xp,
                (kh, kw, 0),
                (kh + (oh - 1) * stride + 1, kw + (ow - 1) * stride + 1, cp),
                (stride, stride, 1),
            ).reshape(oh * ow, cp)
            d = jnp.dot(patch, w_ref[kh, kw], preferred_element_type=jnp.float32)
            part = d if part is None else part + d
        if kh == 0:
            acc_ref[...] = part
        else:
            acc_ref[...] += part

    acc = acc_ref[...]
    y_ref[...] = acc.reshape(1, oh, ow, -1).astype(y_ref.dtype)
    st_ref[0:1, 0:1, :] = jnp.sum(acc, axis=0).reshape(1, 1, -1)
    st_ref[0:1, 1:2, :] = jnp.sum(acc * acc, axis=0).reshape(1, 1, -1)


def conv3x3_stage(x_nhwc, scale, shift, w_hwio, stride):
    n, h, w_sp, cp = x_nhwc.shape
    cout_p = w_hwio.shape[-1]
    oh = (h - 1) // stride + 1       # = (H + 2*pad - 3)//stride + 1 with pad=1
    ow = (w_sp - 1) // stride + 1
    wp = _round_up(w_sp + 2, 8)      # sublane-aligned halo rows
    kernel = functools.partial(_conv3x3_kernel, stride=stride,
                               h=h, w_sp=w_sp, oh=oh, ow=ow)
    return pl.pallas_call(
        kernel,
        grid=(n,),
        in_specs=[
            pl.BlockSpec((1, h, w_sp, cp), lambda i: (i, 0, 0, 0)),
            pl.BlockSpec((1, cp), lambda i: (0, 0)),
            pl.BlockSpec((1, cp), lambda i: (0, 0)),
            pl.BlockSpec((3, 3, cp, cout_p), lambda i: (0, 0, 0, 0)),
        ],
        out_specs=(
            pl.BlockSpec((1, oh, ow, cout_p), lambda i: (i, 0, 0, 0)),
            pl.BlockSpec((1, 2, cout_p), lambda i: (i, 0, 0)),
        ),
        out_shape=(
            jax.ShapeDtypeStruct((n, oh, ow, cout_p), jnp.float32),
            jax.ShapeDtypeStruct((n, 2, cout_p), jnp.float32),
        ),
        scratch_shapes=[
            pltpu.VMEM((h + 2, wp, cp), jnp.float32),
            pltpu.VMEM((oh * ow, cout_p), jnp.float32),
        ],
        compiler_params=pltpu.CompilerParams(
            dimension_semantics=("parallel",),
            vmem_limit_bytes=_VMEM_LIMIT),
    )(x_nhwc, scale, shift, w_hwio)


# ---------------------------------------------------------------------------
# BatchNorm finalize helpers (tiny, plain JAX on the partial sums).
# ---------------------------------------------------------------------------
def _finalize_bn(stats, count, gamma, beta, eps=1e-5):
    s = jnp.sum(stats[:, 0, :], axis=0)
    q = jnp.sum(stats[:, 1, :], axis=0)
    mean = s / count
    var = jnp.maximum(q / count - mean * mean, 0.0)   # biased (training) variance
    scale = gamma * jax.lax.rsqrt(var + eps)
    shift = beta - mean * scale
    return scale.reshape(1, -1), shift.reshape(1, -1)


def _finalize_bn3_fold(sz_p, g_p, count, w3, gamma, beta, eps=1e-5):
    """BN3 stats of y3 = z @ w3 from sum(z) and z^T z; fold into w3 / bias."""
    sz = jnp.sum(sz_p[:, 0, :], axis=0)               # (Cp,)
    g = jnp.sum(g_p, axis=0)                          # (Cp, Cp)
    mean = (sz @ w3) / count                          # (Co_p,)
    e2 = jnp.sum(w3 * (g @ w3), axis=0) / count       # diag(w3^T G w3) / count
    var = jnp.maximum(e2 - mean * mean, 0.0)
    scale = gamma * jax.lax.rsqrt(var + eps)
    shift = beta - mean * scale
    return w3 * scale[None, :], shift.reshape(1, -1)


# ---------------------------------------------------------------------------
# Parameter construction (DiracConv effective weights, padded lane-dense).
# ---------------------------------------------------------------------------
def _l2_normalize_rows(w2d):
    norm = jnp.sqrt(jnp.sum(w2d * w2d, axis=1, keepdims=True))
    return w2d / jnp.maximum(norm, 1e-12)


def make_dirac_weight_oihw(key, out_planes, in_planes, k, alpha=5.0, beta=1e-5):
    """Effective DiracConv2d weight (OIHW): alpha * delta + beta * normalize(W)."""
    w = jax.random.normal(key, (out_planes, in_planes, k, k), jnp.float32) * 0.05
    delta = jnp.zeros_like(w)
    m = min(out_planes, in_planes)
    delta = delta.at[jnp.arange(m), jnp.arange(m), k // 2, k // 2].set(1.0)
    w_norm = _l2_normalize_rows(w.reshape(out_planes, -1)).reshape(w.shape)
    return alpha * delta + beta * w_norm


def _pad_gamma_beta(planes, cp):
    # Padded-channel gamma == 0 keeps padded channels exactly zero after BN.
    g = jnp.pad(jnp.ones((planes,), jnp.float32), (0, cp - planes))
    b = jnp.zeros((cp,), jnp.float32)
    return g, b


def init_bottleneck_woskip(key, inplanes, planes, expansion=4):
    k1, k2, k3 = jax.random.split(key, 3)
    cin_p = _round_up(inplanes, LANE)
    p_p = _round_up(planes, LANE)
    co_p = _round_up(planes * expansion, LANE)

    w1 = make_dirac_weight_oihw(k1, planes, inplanes, 1)[:, :, 0, 0].T  # (Cin, P)
    w1 = jnp.pad(w1, ((0, cin_p - inplanes), (0, p_p - planes)))

    w2 = jnp.transpose(make_dirac_weight_oihw(k2, planes, planes, 3),
                       (2, 3, 1, 0))                                    # HWIO
    w2 = jnp.pad(w2, ((0, 0), (0, 0), (0, p_p - planes), (0, p_p - planes)))

    w3 = make_dirac_weight_oihw(k3, planes * expansion, planes, 1)[:, :, 0, 0].T
    w3 = jnp.pad(w3, ((0, p_p - planes), (0, co_p - planes * expansion)))

    g1, b1 = _pad_gamma_beta(planes, p_p)
    g2, b2 = _pad_gamma_beta(planes, p_p)
    g3, b3 = _pad_gamma_beta(planes * expansion, co_p)

    return {
        "w1": w1, "g1": g1, "b1": b1,
        "w2": w2, "g2": g2, "b2": b2,
        "w3": w3, "g3": g3, "b3": b3,
        "inplanes": inplanes, "planes": planes,
        "out_planes": planes * expansion,
    }


# ---------------------------------------------------------------------------
# Forward pass matching Bottleneckwoskip.forward (NCHW in / NCHW out).
# ---------------------------------------------------------------------------
def bottleneck_woskip(x_nchw, params, stride=1, eps=1e-5):
    n, cin, h, w_sp = x_nchw.shape
    cin_p = params["w1"].shape[0]
    p_p = params["w1"].shape[1]
    co_p = params["w3"].shape[1]

    # NCHW -> NHWC, zero-pad channels to a lane-dense multiple of 128.
    # (Layout plumbing only; padded channels stay exactly zero end-to-end.)
    x = jnp.transpose(x_nchw, (0, 2, 3, 1)).astype(jnp.float32)
    x = jnp.pad(x, ((0, 0), (0, 0), (0, 0), (0, cin_p - cin)))

    ones = jnp.ones((1, cin_p), jnp.float32)
    zeros = jnp.zeros((1, cin_p), jnp.float32)

    # Stage 1: relu(x) -> conv1 (1x1); emits BN1 partial stats.
    m1 = n * h * w_sp
    y1, st1 = pointwise_conv_stats(x.reshape(m1, cin_p), ones, zeros, params["w1"])
    sc1, sh1 = _finalize_bn(st1, m1, params["g1"], params["b1"], eps)

    # Stage 2: bn1+relu fused into input -> conv2 (3x3, stride); BN2 stats.
    y2, st2 = conv3x3_stage(y1.reshape(n, h, w_sp, p_p), sc1, sh1,
                            params["w2"], stride)
    _, oh, ow, _ = y2.shape
    m2 = n * oh * ow
    sc2, sh2 = _finalize_bn(st2, m2, params["g2"], params["b2"], eps)
    y2f = y2.reshape(m2, p_p)

    # Stage 3a: statistics of z = relu(bn2(y2)) on the narrow tensor; derive
    # BN3 scale/shift for y3 = z @ w3 and fold them into the weight / bias.
    szp, gp = z_stats_stage(y2f, sc2, sh2)
    w3_eff, bias3 = _finalize_bn3_fold(szp, gp, m2, params["w3"],
                                       params["g3"], params["b3"], eps)

    # Stage 3b: bn2+relu fused input -> conv3 (1x1) with folded BN3.
    out = pointwise_conv_bias(y2f, sc2, sh2, w3_eff, bias3)

    out = out.reshape(n, oh, ow, co_p)[..., :params["out_planes"]]
    return jnp.transpose(out, (0, 3, 1, 2)).astype(x_nchw.dtype)


if __name__ == "__main__":
    key = jax.random.PRNGKey(0)
    kx, kp = jax.random.split(key)

    N, C, H, W = 2, 4, 16, 16          # inplanes = planes = 4, stride = 1
    x = jax.random.normal(kx, (N, C, H, W), jnp.float32)
    params = init_bottleneck_woskip(kp, inplanes=C, planes=C)

    out = bottleneck_woskip(x, params, stride=1)
    out = jax.block_until_ready(out)
    assert out.shape == (N, 4 * C, H, W), out.shape
    print("KERNEL_OK")
</pallas_src>

<mosaic_0001>
module attributes {stable_mosaic.version = 11 : i64} {
  func.func @_pw_conv_stats_kernel(%arg0: i32, %arg1: memref<512x128xf32, #tpu.memory_space<vmem>>, %arg2: memref<1x128xf32, #tpu.memory_space<vmem>>, %arg3: memref<1x128xf32, #tpu.memory_space<vmem>>, %arg4: memref<128x128xf32, #tpu.memory_space<vmem>>, %arg5: memref<512x128xf32, #tpu.memory_space<vmem>>, %arg6: memref<1x2x128xf32, #tpu.memory_space<vmem>>) attributes {dimension_semantics = [#tpu.dimension_semantics<parallel>], iteration_bounds = array<i64: 1>, scalar_prefetch = 0 : i64, scratch_operands = 0 : i64, tpu.core_type = #tpu.core_type<tc>, window_params = [{transform_indices = @transform_0, window_bounds = array<i64: 512, 128>}, {pipeline_mode = #tpu.pipeline_mode<synchronous>, transform_indices = @transform_1, window_bounds = array<i64: 1, 128>}, {pipeline_mode = #tpu.pipeline_mode<synchronous>, transform_indices = @transform_2, window_bounds = array<i64: 1, 128>}, {pipeline_mode = #tpu.pipeline_mode<synchronous>, transform_indices = @transform_3, window_bounds = array<i64: 128, 128>}, {transform_indices = @transform_4, window_bounds = array<i64: 512, 128>}, {transform_indices = @transform_5, window_bounds = array<i64: 1, 2, 128>}]} {
    %c0 = arith.constant 0 : index
    %c0_0 = arith.constant 0 : index
    %0 = vector.load %arg1[%c0, %c0_0] : memref<512x128xf32, #tpu.memory_space<vmem>>, vector<512x128xf32>
    %c0_1 = arith.constant 0 : index
    %c0_2 = arith.constant 0 : index
    %1 = vector.load %arg2[%c0_1, %c0_2] : memref<1x128xf32, #tpu.memory_space<vmem>>, vector<1x128xf32>
    %2 = vector.broadcast %1 : vector<1x128xf32> to vector<512x128xf32>
    %3 = arith.mulf %0, %2 : vector<512x128xf32>
    %c0_3 = arith.constant 0 : index
    %c0_4 = arith.constant 0 : index
    %4 = vector.load %arg3[%c0_3, %c0_4] : memref<1x128xf32, #tpu.memory_space<vmem>>, vector<1x128xf32>
    %5 = vector.broadcast %4 : vector<1x128xf32> to vector<512x128xf32>
    %6 = arith.addf %3, %5 : vector<512x128xf32>
    %cst = arith.constant 0.000000e+00 : f32
    %7 = vector.broadcast %cst : f32 to vector<512x128xf32>
    %8 = arith.maximumf %6, %7 : vector<512x128xf32>
    %c0_5 = arith.constant 0 : index
    %c0_6 = arith.constant 0 : index
    %9 = vector.load %arg4[%c0_5, %c0_6] : memref<128x128xf32, #tpu.memory_space<vmem>>, vector<128x128xf32>
    %cst_7 = arith.constant dense<0.000000e+00> : vector<512x128xf32>
    %10 = tpu.matmul %8, %9, %cst_7 {dimension_numbers = #tpu.dot_dimension_numbers<[1], [0], [0], [1], [0, 0, 1, 1], [], []>} : vector<512x128xf32>, vector<128x128xf32>, vector<512x128xf32> -> vector<512x128xf32>
    %c0_8 = arith.constant 0 : index
    %c0_9 = arith.constant 0 : index
    %11 = vector.load %arg5[%c0_8, %c0_9] : memref<512x128xf32, #tpu.memory_space<vmem>>, vector<512x128xf32>
    tpu.vector_store %arg5[%c0_8, %c0_9], %10 {strides = array<i32>} : memref<512x128xf32, #tpu.memory_space<vmem>>, vector<512x128xf32>,
    %cst_10 = arith.constant dense<0.000000e+00> : vector<128xf32>
    %12 = vector.multi_reduction <add>, %10, %cst_10 [0] : vector<512x128xf32> to vector<128xf32>
    %13 = vector.shape_cast %12 : vector<128xf32> to vector<1x1x128xf32>
    %c0_11 = arith.constant 0 : index
    %c0_12 = arith.constant 0 : index
    %c0_13 = arith.constant 0 : index
    %14 = vector.load %arg6[%c0_11, %c0_12, %c0_13] : memref<1x2x128xf32, #tpu.memory_space<vmem>>, vector<1x1x128xf32>
    tpu.vector_store %arg6[%c0_11, %c0_12, %c0_13], %13 {strides = array<i32>} : memref<1x2x128xf32, #tpu.memory_space<vmem>>, vector<1x1x128xf32>,
    %15 = arith.mulf %10, %10 : vector<512x128xf32>
    %cst_14 = arith.constant dense<0.000000e+00> : vector<128xf32>
    %16 = vector.multi_reduction <add>, %15, %cst_14 [0] : vector<512x128xf32> to vector<128xf32>
    %17 = vector.shape_cast %16 : vector<128xf32> to vector<1x1x128xf32>
    %c0_15 = arith.constant 0 : index
    %c1 = arith.constant 1 : index
    %c0_16 = arith.constant 0 : index
    %18 = vector.load %arg6[%c0_15, %c1, %c0_16] : memref<1x2x128xf32, #tpu.memory_space<vmem>>, vector<1x1x128xf32>
    tpu.vector_store %arg6[%c0_15, %c1, %c0_16], %17 {strides = array<i32>} : memref<1x2x128xf32, #tpu.memory_space<vmem>>, vector<1x1x128xf32>,
    return
  }
  func.func @transform_0(%arg0: i32) -> (i32, i32) {
    %c0_i32 = arith.constant 0 : i32
    %c0_i32_0 = arith.constant 0 : i32
    return %arg0, %c0_i32 : i32, i32
  }
  func.func @transform_1(%arg0: i32) -> (i32, i32) {
    %c0_i32 = arith.constant 0 : i32
    %c0_i32_0 = arith.constant 0 : i32
    %c0_i32_1 = arith.constant 0 : i32
    return %c0_i32, %c0_i32_0 : i32, i32
  }
  func.func @transform_2(%arg0: i32) -> (i32, i32) {
    %c0_i32 = arith.constant 0 : i32
    %c0_i32_0 = arith.constant 0 : i32
    %c0_i32_1 = arith.constant 0 : i32
    return %c0_i32, %c0_i32_0 : i32, i32
  }
  func.func @transform_3(%arg0: i32) -> (i32, i32) {
    %c0_i32 = arith.constant 0 : i32
    %c0_i32_0 = arith.constant 0 : i32
    %c0_i32_1 = arith.constant 0 : i32
    return %c0_i32, %c0_i32_0 : i32, i32
  }
  func.func @transform_4(%arg0: i32) -> (i32, i32) {
    %c0_i32 = arith.constant 0 : i32
    %c0_i32_0 = arith.constant 0 : i32
    return %arg0, %c0_i32 : i32, i32
  }
  func.func @transform_5(%arg0: i32) -> (i32, i32, i32) {
    %c0_i32 = arith.constant 0 : i32
    %c0_i32_0 = arith.constant 0 : i32
    %c0_i32_1 = arith.constant 0 : i32
    return %arg0, %c0_i32, %c0_i32_0 : i32, i32, i32
  }
}

</mosaic_0001>

<bundles_post_ra>
// kernel: tpu_custom_call.1
= control target key start
LH: loop header
LB: loop body
LE: loop exit
PB: predicated region body
PF: predicated region fallthrough
CT: control target
= control target key end

     0   :  { %11 = vsyncpa [#allocation3], 0  ;;  %s1528_s0 = inlined_call_operand.hbm [shape: f32[512,128], index: 0, kind: input, shape index: {}]   ;;  %s1529_s1 = inlined_call_operand.hbm [shape: f32[1,128], index: 1, kind: input, shape index: {}]   ;;  %s1530_s2 = inlined_call_operand.vmem [shape: f32[1,128], index: 2, kind: input, shape index: {}]   ;;  %s1531_s3 = inlined_call_operand.hbm [shape: f32[128,128], index: 3, kind: input, shape index: {}]   ;;  %s1532_s4 = inlined_call_operand.hbm [shape: f32[512,128], index: 4, kind: output, shape index: {0}]   ;;  %s1533_s5 = inlined_call_operand.hbm [shape: f32[1,2,128], index: 5, kind: output, shape index: {1}]  }
   0x1   :  { %12 = vsyncpa [#allocation6], 0 }
   0x2   :  { %13 = vsyncpa [#allocation4], 0  ;;  %s33_s20 = sshll.u32 %s1529_s1, 4  ;;  %s34_s20 = int_to_ptr.hbm [resolvable:$true] %s33_s20 }
   0x3   :  { %14 = vsyncpa [#allocation10], 0  ;;  %s1044_s21 = smov [#allocation5]   ;;  %s19_s25 = sshll.u32 %s1528_s0, 4  ;;  %s20_s25 = int_to_ptr.hbm [resolvable:$true] %s19_s25 }
   0x4   :  { %s35_s22 = sshll.u32 %s1044_s21, 4  ;;  %s1045_s26 = smov [#allocation2]   ;;  %s36_s22 = int_to_ptr.vmem [resolvable:$true] %s35_s22 }
   0x5   :  { %38 = dma.hbm_to_vmem [thread:$0]  %s34_s20, 16, %s36_s22, [#allocation6]  }
   0x6   :  { %s21_s27 = sshll.u32 %s1045_s26, 4  ;;  %s1046_s28 = smov 128   ;;  %s22_s27 = int_to_ptr.vmem [resolvable:$true] %s21_s27 }
   0x7   :  { %s1047_s29 = smov 8   ;;  %s45_s6 = sshll.u32 %s1531_s3, 4  ;;  %s46_s6 = int_to_ptr.hbm [resolvable:$true] %s45_s6 }
   0x8   :  { %27 = dma.hbm_to_vmem [thread:$0]  %s20_s25, 8192, %s22_s27, [#allocation3], %s1046_s28, %s1046_s28, %s1047_s29  }
   0x9   :  { %s1048_s7 = smov [#allocation7]  }
   0xa   :  { %s47_s8 = sshll.u32 %s1048_s7, 4  ;;  %s48_s8 = int_to_ptr.vmem [resolvable:$true] %s47_s8 }
   0xb   :  { %53 = dma.hbm_to_vmem [thread:$0]  %s46_s6, 2048, %s48_s8, [#allocation6], %s1046_s28, %s1046_s28, %s1047_s29  }
   0xc   :  { %1036 = dma.done.wait [#allocation3], 8192  }
   0xd   :  { %1037 = vsyncadd [#allocation3], 4294959104 }
   0xe   :  { %1038 = dma.done.wait [#allocation6], 2064  }
   0xf   :  { %1039 = vsyncadd [#allocation6], 4294965232  ;;  %v345_v0 = vld [vmem:[#allocation7 + $0x78] sm:$0xff]  ;;  %v344_v1 = vld [vmem:[#allocation7 + $0x70] sm:$0xff]  ;;  %s829_s12 = sshll.u32 %s1532_s4, 4  ;;  %s1050_s4 = smov [#allocation9]   ;;  %s830_s12 = int_to_ptr.hbm [resolvable:$true] %s829_s12 }
  0x10   :  { %346 = vmatpush.msra.mxu0 %v345_v0  ;;  %859 = vmatpush.msra.mxu1 %v345_v0  ;;  %v343_v2 = vld [vmem:[#allocation7 + $0x68] sm:$0xff]  ;;  %v342_v3 = vld [vmem:[#allocation7 + $0x60] sm:$0xff]  ;;  %v341_v4 = vld [vmem:[#allocation7 + $0x58] sm:$0xff]  ;;  %s841_s13 = sshll.u32 %s1050_s4, 4  ;;  %s843_s16 = sshll.u32 %s1533_s5, 4  ;;  %s842_s13 = int_to_ptr.vmem [resolvable:$true] %s841_s13  ;;  %s844_s16 = int_to_ptr.hbm [resolvable:$true] %s843_s16 }
  0x11   :  { %860 = vmatpush.msra.mxu2 %v345_v0  ;;  %861 = vmatpush.msra.mxu3 %v345_v0  ;;  %v340_v5 = vld [vmem:[#allocation7 + $0x50] sm:$0xff]  ;;  %v339_v6 = vld [vmem:[#allocation7 + $0x48] sm:$0xff]  ;;  %v338_v7 = vld [vmem:[#allocation7 + $0x40] sm:$0xff] }
  0x12   :  { %347 = vmatpush.msra.mxu0 %v344_v1  ;;  %862 = vmatpush.msra.mxu1 %v344_v1  ;;  %v337_v8 = vld [vmem:[#allocation7 + $0x38] sm:$0xff]  ;;  %v336_v9 = vld [vmem:[#allocation7 + $0x30] sm:$0xff]  ;;  %v335_v12 = vld [vmem:[#allocation7 + $0x28] sm:$0xff] }
  0x13   :  { %863 = vmatpush.msra.mxu2 %v344_v1  ;;  %864 = vmatpush.msra.mxu3 %v344_v1  ;;  %v1096_v10 = vld [vmem:[#allocation5] ss:$0 sm:$0xff]  ;;  %v334_v13 = vld [vmem:[#allocation7 + $0x20] sm:$0xff]  ;;  %v332_v17 = vld [vmem:[#allocation7 + $0x10] sm:$0xff] }
  0x14   :  { %348 = vmatpush.msra.mxu0 %v343_v2  ;;  %865 = vmatpush.msra.mxu1 %v343_v2  ;;  %v66_v11 = vld [vmem:[#allocation2] sm:$0xff]  ;;  %v67_v19 = vld [vmem:[#allocation2 + $0x8] sm:$0xff]  ;;  %v68_v29 = vld [vmem:[#allocation2 + $0x10] sm:$0xff] }
  0x15   :  { %866 = vmatpush.msra.mxu2 %v343_v2  ;;  %867 = vmatpush.msra.mxu3 %v343_v2  ;;  %v134_v14 = vmul.f32 %v1096_v10, %v66_v11  ;;  %v1102_v15 = vld [vmem:[%s1530_s2] ss:$0 sm:$0xff]  ;;  %v331_v21 = vld [vmem:[#allocation7 + $0x8] sm:$0xff]  ;;  %v330_v23 = vld [vmem:[#allocation7] sm:$0xff]  ;;  %v135_v25 = vmul.f32 %v1096_v10, %v67_v19  ;;  %v136_v33 = vmul.f32 %v1096_v10, %v68_v29  ;;  %s1049_s2 = smov [#allocation8]  }
  0x16   :  { %349 = vmatpush.msra.mxu0 %v342_v3  ;;  %868 = vmatpush.msra.mxu1 %v342_v3  ;;  %v333_v16 = vld [vmem:[#allocation7 + $0x18] sm:$0xff]  ;;  %v83_v30 = vld [vmem:[#allocation2 + $0x88] sm:$0xff]  ;;  %v84_v38 = vld [vmem:[#allocation2 + $0x90] sm:$0xff]  ;;  %s827_s9 = sshll.u32 %s1049_s2, 4  ;;  %s828_s9 = int_to_ptr.vmem [resolvable:$true] %s827_s9 }
  0x17   :  { %869 = vmatpush.msra.mxu2 %v342_v3  ;;  %870 = vmatpush.msra.mxu3 %v342_v3  ;;  %v202_v18 = vadd.f32 %v1102_v15, %v134_v14  ;;  %v82_v20 = vld [vmem:[#allocation2 + $0x80] sm:$0xff]  ;;  %v203_v28 = vadd.f32 %v1102_v15, %v135_v25  ;;  %v151_v31 = vmul.f32 %v1096_v10, %v83_v30  ;;  %v69_v37 = vld [vmem:[#allocation2 + $0x18] sm:$0xff]  ;;  %v71_v57 = vld [vmem:[#allocation2 + $0x28] sm:$0xff] }
  0x18   :  { %350 = vmatpush.msra.mxu0 %v341_v4  ;;  %871 = vmatpush.msra.mxu1 %v341_v4  ;;  %v150_v22 = vmul.f32 %v1096_v10, %v82_v20  ;;  %v204_v36 = vadd.f32 %v1102_v15, %v136_v33  ;;  %v152_v39 = vmul.f32 %v1096_v10, %v84_v38  ;;  %v70_v45 = vld [vmem:[#allocation2 + $0x20] sm:$0xff]  ;;  %v85_v46 = vld [vmem:[#allocation2 + $0x98] sm:$0xff]  ;;  %v99_v60 = vld [vmem:[#allocation2 + $0x108] sm:$0xff] }
  0x19   :  { %872 = vmatpush.msra.mxu2 %v341_v4  ;;  %873 = vmatpush.msra.mxu3 %v341_v4  ;;  %v266_v24 = vmax.f32 %v202_v18, 0.0  ;;  %v267_v32 = vmax.f32 %v203_v28, 0.0  ;;  %v219_v34 = vadd.f32 %v1102_v15, %v151_v31  ;;  %v137_v41 = vmul.f32 %v1096_v10, %v69_v37  ;;  %v98_v48 = vld [vmem:[#allocation2 + $0x100] sm:$0xff]  ;;  %v73_v19 = vld [vmem:[#allocation2 + $0x38] sm:$0xff]  ;;  %v88_v20 = vld [vmem:[#allocation2 + $0xb0] sm:$0xff] }
  0x1a   :  { %351 = vmatpush.msra.mxu0 %v340_v5  ;;  %874 = vmatpush.msra.mxu1 %v340_v5  ;;  %v218_v26 = vadd.f32 %v1102_v15, %v150_v22  ;;  %v268_v40 = vmax.f32 %v204_v36, 0.0  ;;  %v220_v42 = vadd.f32 %v1102_v15, %v152_v39  ;;  %v153_v47 = vmul.f32 %v1096_v10, %v85_v46  ;;  %v86_v58 = vld [vmem:[#allocation2 + $0xa0] sm:$0xff]  ;;  %v101_v22 = vld [vmem:[#allocation2 + $0x118] sm:$0xff] }
  0x1b   :  { %875 = vmatpush.msra.mxu2 %v340_v5  ;;  %876 = vmatpush.msra.mxu3 %v340_v5  ;;  %v283_v35 = vmax.f32 %v219_v34, 0.0  ;;  %v205_v44 = vadd.f32 %v1102_v15, %v137_v41  ;;  %v138_v50 = vmul.f32 %v1096_v10, %v70_v45  ;;  %v166_v52 = vmul.f32 %v1096_v10, %v98_v48  ;;  %v72_v5 = vld [vmem:[#allocation2 + $0x30] sm:$0xff]  ;;  %v74_v30 = vld [vmem:[#allocation2 + $0x40] sm:$0xff] }
  0x1c   :  { %352 = vmatpush.msra.mxu0 %v339_v6  ;;  %877 = vmatpush.msra.mxu1 %v339_v6  ;;  %v282_v27 = vmax.f32 %v218_v26, 0.0  ;;  %v284_v43 = vmax.f32 %v220_v42, 0.0  ;;  %v221_v51 = vadd.f32 %v1102_v15, %v153_v47  ;;  %v154_v59 = vmul.f32 %v1096_v10, %v86_v58  ;;  %v114_v36 = vld [vmem:[#allocation2 + $0x180] sm:$0xff]  ;;  %v75_v47 = vld [vmem:[#allocation2 + $0x48] sm:$0xff] }
  0x1d   :  { %878 = vmatpush.msra.mxu2 %v339_v6  ;;  %879 = vmatpush.msra.mxu3 %v339_v6  ;;  %v269_v49 = vmax.f32 %v205_v44, 0.0  ;;  %v234_v54 = vadd.f32 %v1102_v15, %v166_v52  ;;  %v206_v55 = vadd.f32 %v1102_v15, %v138_v50  ;;  %v139_v62 = vmul.f32 %v1096_v10, %v71_v57  ;;  %v87_v6 = vld [vmem:[#allocation2 + $0xa8] sm:$0xff]  ;;  %v90_v48 = vld [vmem:[#allocation2 + $0xc0] sm:$0xff] }
  0x1e   :  { %353 = vmatpush.msra.mxu0 %v338_v7  ;;  %880 = vmatpush.msra.mxu1 %v338_v7  ;;  %v285_v53 = vmax.f32 %v221_v51, 0.0  ;;  %v222_v63 = vadd.f32 %v1102_v15, %v154_v59  ;;  %v167_v0 = vmul.f32 %v1096_v10, %v99_v60  ;;  %v140_v11 = vmul.f32 %v1096_v10, %v72_v5  ;;  %v103_v51 = vld [vmem:[#allocation2 + $0x128] sm:$0xff] }
  0x1f   :  { %881 = vmatpush.msra.mxu2 %v338_v7  ;;  %882 = vmatpush.msra.mxu3 %v338_v7  ;;  %v298_v56 = vmax.f32 %v234_v54, 0.0  ;;  %v270_v61 = vmax.f32 %v206_v55, 0.0  ;;  %v207_v3 = vadd.f32 %v1102_v15, %v139_v62  ;;  %v155_v7 = vmul.f32 %v1096_v10, %v87_v6  ;;  %v115_v52 = vld [vmem:[#allocation2 + $0x188] sm:$0xff] }
  0x20   :  { %354 = vmatpush.msra.mxu0 %v337_v8  ;;  %883 = vmatpush.msra.mxu1 %v337_v8  ;;  %v286_v1 = vmax.f32 %v222_v63, 0.0  ;;  %v235_v2 = vadd.f32 %v1102_v15, %v167_v0  ;;  %v169_v26 = vmul.f32 %v1096_v10, %v101_v22  ;;  %v142_v34 = vmul.f32 %v1096_v10, %v74_v30  ;;  %v91_v0 = vld [vmem:[#allocation2 + $0xc8] sm:$0xff]  ;;  %v117_v22 = vld [vmem:[#allocation2 + $0x198] sm:$0xff] }
  0x21   :  { %884 = vmatpush.msra.mxu2 %v337_v8  ;;  %885 = vmatpush.msra.mxu3 %v337_v8  ;;  %v100_v8 = vld [vmem:[#allocation2 + $0x110] sm:$0xff]  ;;  %v171_v55 = vmul.f32 %v1096_v10, %v103_v51 }
  0x22   :  { %355 = vmatpush.msra.mxu0 %v336_v9  ;;  %886 = vmatpush.msra.mxu1 %v336_v9  ;;  %v299_v4 = vmax.f32 %v235_v2, 0.0  ;;  %v237_v28 = vadd.f32 %v1102_v15, %v169_v26  ;;  %v210_v44 = vadd.f32 %v1102_v15, %v142_v34  ;;  %v185_v26 = vmul.f32 %v1096_v10, %v117_v22  ;;  %v93_v34 = vld [vmem:[#allocation2 + $0xd8] sm:$0xff] }
  0x23   :  { %887 = vmatpush.msra.mxu2 %v336_v9  ;;  %888 = vmatpush.msra.mxu3 %v336_v9  ;;  %v271_v9 = vmax.f32 %v207_v3, 0.0  ;;  %v239_v58 = vadd.f32 %v1102_v15, %v171_v55  ;;  %v104_v3 = vld [vmem:[#allocation2 + $0x130] sm:$0xff] }
  0x24   :  { %356 = vmatpush.msra.mxu0 %v335_v12  ;;  %889 = vmatpush.msra.mxu1 %v335_v12  ;;  %v301_v31 = vmax.f32 %v237_v28, 0.0  ;;  %v274_v50 = vmax.f32 %v210_v44, 0.0 }
  0x25   :  { %890 = vmatpush.msra.mxu2 %v335_v12  ;;  %891 = vmatpush.msra.mxu3 %v335_v12  ;;  %v223_v12 = vadd.f32 %v1102_v15, %v155_v7  ;;  %v303_v62 = vmax.f32 %v239_v58, 0.0  ;;  %v172_v7 = vmul.f32 %v1096_v10, %v104_v3 }
  0x26   :  { %357 = vmatpush.msra.mxu0 %v334_v13  ;;  %892 = vmatpush.msra.mxu1 %v334_v13 }
  0x27   :  { %893 = vmatpush.msra.mxu2 %v334_v13  ;;  %894 = vmatpush.msra.mxu3 %v334_v13  ;;  %v168_v13 = vmul.f32 %v1096_v10, %v100_v8  ;;  %v287_v14 = vmax.f32 %v223_v12, 0.0 }
  0x28   :  { %358 = vmatpush.msra.mxu0 %v333_v16  ;;  %895 = vmatpush.msra.mxu1 %v333_v16 }
  0x29   :  { %896 = vmatpush.msra.mxu2 %v333_v16  ;;  %897 = vmatpush.msra.mxu3 %v333_v16  ;;  %v236_v16 = vadd.f32 %v1102_v15, %v168_v13 }
  0x2a   :  { %359 = vmatpush.msra.mxu0 %v332_v17  ;;  %898 = vmatpush.msra.mxu1 %v332_v17 }
  0x2b   :  { %899 = vmatpush.msra.mxu2 %v332_v17  ;;  %900 = vmatpush.msra.mxu3 %v332_v17  ;;  %v208_v17 = vadd.f32 %v1102_v15, %v140_v11  ;;  %v300_v18 = vmax.f32 %v236_v16, 0.0  ;;  %v240_v11 = vadd.f32 %v1102_v15, %v172_v7 }
  0x2c   :  { %360 = vmatpush.msra.mxu0 %v331_v21  ;;  %901 = vmatpush.msra.mxu1 %v331_v21 }
  0x2d   :  { %902 = vmatpush.msra.mxu2 %v331_v21  ;;  %903 = vmatpush.msra.mxu3 %v331_v21  ;;  %v156_v21 = vmul.f32 %v1096_v10, %v88_v20 }
  0x2e   :  { %361 = vmatpush.msra.mxu0 %v330_v23  ;;  %904 = vmatpush.msra.mxu1 %v330_v23 }
  0x2f   :  { %362 = vmatmul.f32.vlgmr.msra.gmra.mxu0 %v266_v24  ;;  %410 = vmatmul.f32.vlgmr.msra.gmra.mxu1 %v282_v27  ;;  %v141_v24 = vmul.f32 %v1096_v10, %v73_v19  ;;  %v224_v25 = vadd.f32 %v1102_v15, %v156_v21  ;;  %v105_v21 = vld [vmem:[#allocation2 + $0x138] sm:$0xff] }
  0x30   :  { %905 = vmatpush.msra.mxu2 %v330_v23  ;;  %906 = vmatpush.msra.mxu3 %v330_v23  ;;  %v272_v23 = vmax.f32 %v208_v17, 0.0  ;;  %v77_v17 = vld [vmem:[#allocation2 + $0x58] sm:$0xff] }
  0x31   :  { %458 = vmatmul.f32.vlgmr.msra.gmra.mxu2 %v298_v56  ;;  %v288_v27 = vmax.f32 %v224_v25, 0.0  ;;  %v209_v29 = vadd.f32 %v1102_v15, %v141_v24  ;;  %v183_v56 = vmul.f32 %v1096_v10, %v115_v52  ;;  %v173_v25 = vmul.f32 %v1096_v10, %v105_v21 }
  0x33   :  { %v273_v37 = vmax.f32 %v209_v29, 0.0  ;;  %v251_v59 = vadd.f32 %v1102_v15, %v183_v56  ;;  %v241_v28 = vadd.f32 %v1102_v15, %v173_v25  ;;  %v253_v29 = vadd.f32 %v1102_v15, %v185_v26 }
  0x35   :  { %v315_v63 = vmax.f32 %v251_v59, 0.0 }
  0x37   :  { %365 = vmatmul.f32.gmra.mxu0 %v267_v32  ;;  %413 = vmatmul.f32.gmra.mxu1 %v283_v35  ;;  %v89_v32 = vld [vmem:[#allocation2 + $0xb8] sm:$0xff]  ;;  %v102_v35 = vld [vmem:[#allocation2 + $0x120] sm:$0xff] }
  0x38   :  { %v157_v33 = vmul.f32 %v1096_v10, %v89_v32  ;;  %v170_v39 = vmul.f32 %v1096_v10, %v102_v35  ;;  %v305_v32 = vmax.f32 %v241_v28, 0.0  ;;  %v161_v35 = vmul.f32 %v1096_v10, %v93_v34 }
  0x39   :  { %461 = vmatmul.f32.gmra.mxu2 %v299_v4  ;;  %v116_v4 = vld [vmem:[#allocation2 + $0x190] sm:$0xff] }
  0x3a   :  { %v225_v38 = vadd.f32 %v1102_v15, %v157_v33  ;;  %v238_v42 = vadd.f32 %v1102_v15, %v170_v39  ;;  %v184_v8 = vmul.f32 %v1096_v10, %v116_v4  ;;  %v317_v33 = vmax.f32 %v253_v29, 0.0 }
  0x3c   :  { %v289_v41 = vmax.f32 %v225_v38, 0.0  ;;  %v302_v45 = vmax.f32 %v238_v42, 0.0  ;;  %v252_v12 = vadd.f32 %v1102_v15, %v184_v8  ;;  %v118_v38 = vld [vmem:[#allocation2 + $0x1a0] sm:$0xff] }
  0x3d   :  { %v186_v42 = vmul.f32 %v1096_v10, %v118_v38  ;;  %v122_v38 = vld [vmem:[#allocation2 + $0x1c0] sm:$0xff] }
  0x3e   :  { %v316_v16 = vmax.f32 %v252_v12, 0.0 }
  0x3f   :  { %368 = vmatmul.f32.gmra.mxu0 %v268_v40  ;;  %416 = vmatmul.f32.gmra.mxu1 %v284_v43  ;;  %v182_v40 = vmul.f32 %v1096_v10, %v114_v36 }
  0x41   :  { %464 = vmatmul.f32.gmra.mxu2 %v300_v18  ;;  %v250_v43 = vadd.f32 %v1102_v15, %v182_v40  ;;  %v92_v18 = vld [vmem:[#allocation2 + $0xd0] sm:$0xff]  ;;  %v229_v40 = vadd.f32 %v1102_v15, %v161_v35  ;;  %v97_v35 = vld [vmem:[#allocation2 + $0xf8] sm:$0xff] }
  0x42   :  { %v160_v19 = vmul.f32 %v1096_v10, %v92_v18 }
  0x43   :  { %v314_v46 = vmax.f32 %v250_v43, 0.0  ;;  %v293_v43 = vmax.f32 %v229_v40, 0.0 }
  0x44   :  { %v228_v24 = vadd.f32 %v1102_v15, %v160_v19  ;;  %v81_v19 = vld [vmem:[#allocation2 + $0x78] sm:$0xff] }
  0x45   :  { %506 = vmatmul.f32.vlgmr.msra.gmra.mxu3 %v314_v46  ;;  %v149_v25 = vmul.f32 %v1096_v10, %v81_v19 }
  0x47   :  { %371 = vmatmul.f32.gmra.mxu0 %v269_v49  ;;  %419 = vmatmul.f32.gmra.mxu1 %v285_v53  ;;  %v158_v49 = vmul.f32 %v1096_v10, %v90_v48  ;;  %v143_v53 = vmul.f32 %v1096_v10, %v75_v47 }
  0x49   :  { %467 = vmatmul.f32.gmra.mxu2 %v301_v31  ;;  %v226_v54 = vadd.f32 %v1102_v15, %v158_v49  ;;  %v211_v60 = vadd.f32 %v1102_v15, %v143_v53  ;;  %v78_v31 = vld [vmem:[#allocation2 + $0x60] sm:$0xff]  ;;  %v79_v49 = vld [vmem:[#allocation2 + $0x68] sm:$0xff] }
  0x4a   :  { %v146_v36 = vmul.f32 %v1096_v10, %v78_v31  ;;  %v107_v53 = vld [vmem:[#allocation2 + $0x148] sm:$0xff]  ;;  %v147_v55 = vmul.f32 %v1096_v10, %v79_v49 }
  0x4b   :  { %v290_v57 = vmax.f32 %v226_v54, 0.0  ;;  %v275_v5 = vmax.f32 %v211_v60, 0.0  ;;  %v119_v54 = vld [vmem:[#allocation2 + $0x1a8] sm:$0xff] }
  0x4c   :  { %v214_v46 = vadd.f32 %v1102_v15, %v146_v36  ;;  %v187_v58 = vmul.f32 %v1096_v10, %v119_v54  ;;  %v165_v36 = vmul.f32 %v1096_v10, %v97_v35  ;;  %v123_v49 = vld [vmem:[#allocation2 + $0x1c8] sm:$0xff] }
  0x4d   :  { %509 = vmatmul.f32.gmra.mxu3 %v315_v63  ;;  %v80_v63 = vld [vmem:[#allocation2 + $0x70] sm:$0xff] }
  0x4e   :  { %v278_v52 = vmax.f32 %v214_v46, 0.0  ;;  %v148_v4 = vmul.f32 %v1096_v10, %v80_v63  ;;  %v233_v40 = vadd.f32 %v1102_v15, %v165_v36 }
  0x4f   :  { %374 = vmatmul.f32.gmra.mxu0 %v270_v61  ;;  %422 = vmatmul.f32.gmra.mxu1 %v286_v1  ;;  %v76_v61 = vld [vmem:[#allocation2 + $0x50] sm:$0xff]  ;;  %v159_v1 = vmul.f32 %v1096_v10, %v91_v0 }
  0x50   :  { %v144_v2 = vmul.f32 %v1096_v10, %v76_v61  ;;  %v255_v61 = vadd.f32 %v1102_v15, %v187_v58  ;;  %v112_v58 = vld [vmem:[#allocation2 + $0x170] sm:$0xff] }
  0x51   :  { %470 = vmatmul.f32.gmra.mxu2 %v302_v45  ;;  %v227_v6 = vadd.f32 %v1102_v15, %v159_v1  ;;  %v254_v45 = vadd.f32 %v1102_v15, %v186_v42  ;;  %v190_v42 = vmul.f32 %v1096_v10, %v122_v38 }
  0x52   :  { %v212_v13 = vadd.f32 %v1102_v15, %v144_v2  ;;  %v319_v1 = vmax.f32 %v255_v61, 0.0  ;;  %v95_v2 = vld [vmem:[#allocation2 + $0xe8] sm:$0xff] }
  0x53   :  { %v318_v48 = vmax.f32 %v254_v45, 0.0  ;;  %v163_v3 = vmul.f32 %v1096_v10, %v95_v2  ;;  %v258_v45 = vadd.f32 %v1102_v15, %v190_v42  ;;  %v128_v42 = vld [vmem:[#allocation2 + $0x1f0] sm:$0xff] }
  0x54   :  { %v276_v20 = vmax.f32 %v212_v13, 0.0 }
  0x55   :  { %512 = vmatmul.f32.gmra.mxu3 %v316_v16  ;;  %v231_v8 = vadd.f32 %v1102_v15, %v163_v3  ;;  %v216_v16 = vadd.f32 %v1102_v15, %v148_v4 }
  0x57   :  { %377 = vmatmul.f32.gmra.mxu0 %v271_v9  ;;  %425 = vmatmul.f32.gmra.mxu1 %v287_v14  ;;  %v291_v9 = vmax.f32 %v227_v6, 0.0  ;;  %v304_v14 = vmax.f32 %v240_v11, 0.0  ;;  %v120_v6 = vld [vmem:[#allocation2 + $0x1b0] sm:$0xff]  ;;  %v295_v12 = vmax.f32 %v231_v8, 0.0  ;;  %v280_v22 = vmax.f32 %v216_v16, 0.0  ;;  %v113_v8 = vld [vmem:[#allocation2 + $0x178] sm:$0xff] }
  0x58   :  { %v188_v11 = vmul.f32 %v1096_v10, %v120_v6 }
  0x59   :  { %473 = vmatmul.f32.gmra.mxu2 %v303_v62  ;;  %v215_v62 = vadd.f32 %v1102_v15, %v147_v55 }
  0x5b   :  { %v279_v7 = vmax.f32 %v215_v62, 0.0 }
  0x5d   :  { %515 = vmatmul.f32.gmra.mxu3 %v317_v33 }
  0x5f   :  { %380 = vmatmul.f32.gmra.mxu0 %v272_v23  ;;  %428 = vmatmul.f32.gmra.mxu1 %v288_v27  ;;  %v145_v23 = vmul.f32 %v1096_v10, %v77_v17  ;;  %v292_v27 = vmax.f32 %v228_v24, 0.0  ;;  %v121_v24 = vld [vmem:[#allocation2 + $0x1b8] sm:$0xff] }
  0x60   :  { %v189_v28 = vmul.f32 %v1096_v10, %v121_v24 }
  0x61   :  { %476 = vmatmul.f32.gmra.mxu2 %v304_v14  ;;  %v213_v30 = vadd.f32 %v1102_v15, %v145_v23  ;;  %v256_v14 = vadd.f32 %v1102_v15, %v188_v11  ;;  %v109_v23 = vld [vmem:[#allocation2 + $0x158] sm:$0xff]  ;;  %v181_v11 = vmul.f32 %v1096_v10, %v113_v8 }
  0x62   :  { %v257_v31 = vadd.f32 %v1102_v15, %v189_v28 }
  0x63   :  { %v277_v39 = vmax.f32 %v213_v30, 0.0  ;;  %v320_v18 = vmax.f32 %v256_v14, 0.0 }
  0x64   :  { %v321_v34 = vmax.f32 %v257_v31, 0.0 }
  0x65   :  { %518 = vmatmul.f32.gmra.mxu3 %v318_v48  ;;  %v111_v48 = vld [vmem:[#allocation2 + $0x168] sm:$0xff] }
  0x67   :  { %383 = vmatmul.f32.gmra.mxu0 %v273_v37  ;;  %431 = vmatmul.f32.gmra.mxu1 %v289_v41  ;;  %v106_v37 = vld [vmem:[#allocation2 + $0x140] sm:$0xff] }
  0x68   :  { %v174_v41 = vmul.f32 %v1096_v10, %v106_v37  ;;  %v110_v37 = vld [vmem:[#allocation2 + $0x160] sm:$0xff] }
  0x69   :  { %479 = vmatmul.f32.gmra.mxu2 %v305_v32  ;;  %v217_v32 = vadd.f32 %v1102_v15, %v149_v25 }
  0x6a   :  { %v242_v44 = vadd.f32 %v1102_v15, %v174_v41  ;;  %v178_v41 = vmul.f32 %v1096_v10, %v110_v37 }
  0x6c   :  { %v306_v47 = vmax.f32 %v242_v44, 0.0  ;;  %v246_v44 = vadd.f32 %v1102_v15, %v178_v41 }
  0x6d   :  { %521 = vmatmul.f32.gmra.mxu3 %v319_v1 }
  0x6e   :  { %v310_v46 = vmax.f32 %v246_v44, 0.0 }
  0x6f   :  { %386 = vmatmul.f32.gmra.mxu0 %v274_v50  ;;  %434 = vmatmul.f32.gmra.mxu1 %v290_v57  ;;  %v94_v50 = vld [vmem:[#allocation2 + $0xe0] sm:$0xff]  ;;  %v175_v57 = vmul.f32 %v1096_v10, %v107_v53 }
  0x70   :  { %v162_v51 = vmul.f32 %v1096_v10, %v94_v50  ;;  %v179_v50 = vmul.f32 %v1096_v10, %v111_v48 }
  0x71   :  { %482 = vmatmul.f32.gmra.mxu2 %v306_v47  ;;  %v243_v60 = vadd.f32 %v1102_v15, %v175_v57  ;;  %v322_v47 = vmax.f32 %v258_v45, 0.0 }
  0x72   :  { %v230_v56 = vadd.f32 %v1102_v15, %v162_v51  ;;  %v191_v51 = vmul.f32 %v1096_v10, %v123_v49  ;;  %v247_v54 = vadd.f32 %v1102_v15, %v179_v50  ;;  %v129_v49 = vld [vmem:[#allocation2 + $0x1f8] sm:$0xff] }
  0x73   :  { %v307_v0 = vmax.f32 %v243_v60, 0.0  ;;  %v180_v60 = vmul.f32 %v1096_v10, %v112_v58  ;;  %v197_v50 = vmul.f32 %v1096_v10, %v129_v49 }
  0x74   :  { %v294_v59 = vmax.f32 %v230_v56, 0.0  ;;  %v259_v55 = vadd.f32 %v1102_v15, %v191_v51  ;;  %v311_v56 = vmax.f32 %v247_v54, 0.0 }
  0x75   :  { %524 = vmatmul.f32.gmra.mxu3 %v320_v18  ;;  %v248_v3 = vadd.f32 %v1102_v15, %v180_v60  ;;  %v249_v18 = vadd.f32 %v1102_v15, %v181_v11 }
  0x76   :  { %v323_v57 = vmax.f32 %v259_v55, 0.0  ;;  %v265_v55 = vadd.f32 %v1102_v15, %v197_v50 }
  0x77   :  { %389 = vmatmul.f32.gmra.mxu0 %v275_v5  ;;  %437 = vmatmul.f32.gmra.mxu1 %v291_v9  ;;  %v108_v5 = vld [vmem:[#allocation2 + $0x150] sm:$0xff]  ;;  %v312_v6 = vmax.f32 %v248_v3, 0.0 }
  0x78   :  { %v176_v9 = vmul.f32 %v1096_v10, %v108_v5 }
  0x79   :  { %485 = vmatmul.f32.gmra.mxu2 %v307_v0 }
  0x7a   :  { %v244_v13 = vadd.f32 %v1102_v15, %v176_v9  ;;  %v125_v9 = vld [vmem:[#allocation2 + $0x1d8] sm:$0xff] }
  0x7c   :  { %v308_v17 = vmax.f32 %v244_v13, 0.0 }
  0x7d   :  { %527 = vmatmul.f32.gmra.mxu3 %v321_v34 }
  0x7f   :  { %392 = vmatmul.f32.gmra.mxu0 %v276_v20  ;;  %440 = vmatmul.f32.gmra.mxu1 %v292_v27  ;;  %v96_v20 = vld [vmem:[#allocation2 + $0xf0] sm:$0xff]  ;;  %v177_v27 = vmul.f32 %v1096_v10, %v109_v23  ;;  %v126_v23 = vld [vmem:[#allocation2 + $0x1e0] sm:$0xff] }
  0x80   :  { %v164_v21 = vmul.f32 %v1096_v10, %v96_v20  ;;  %v194_v24 = vmul.f32 %v1096_v10, %v126_v23 }
  0x81   :  { %488 = vmatmul.f32.gmra.mxu2 %v308_v17  ;;  %v245_v30 = vadd.f32 %v1102_v15, %v177_v27 }
  0x82   :  { %v232_v26 = vadd.f32 %v1102_v15, %v164_v21  ;;  %v313_v21 = vmax.f32 %v249_v18, 0.0 }
  0x83   :  { %v309_v33 = vmax.f32 %v245_v30, 0.0 }
  0x84   :  { %v296_v29 = vmax.f32 %v232_v26, 0.0 }
  0x85   :  { %530 = vmatmul.f32.gmra.mxu3 %v322_v47 }
  0x87   :  { %395 = vmatmul.f32.gmra.mxu0 %v277_v39  ;;  %443 = vmatmul.f32.gmra.mxu1 %v293_v43  ;;  %v281_v39 = vmax.f32 %v217_v32, 0.0  ;;  %v297_v43 = vmax.f32 %v233_v40, 0.0  ;;  %v127_v32 = vld [vmem:[#allocation2 + $0x1e8] sm:$0xff] }
  0x89   :  { %491 = vmatmul.f32.gmra.mxu2 %v309_v33  ;;  %v195_v33 = vmul.f32 %v1096_v10, %v127_v32 }
  0x8d   :  { %533 = vmatmul.f32.gmra.mxu3 %v323_v57 }
  0x8f   :  { %398 = vmatmul.f32.gmra.mxu0 %v278_v52  ;;  %446 = vmatmul.f32.gmra.mxu1 %v294_v59  ;;  %v124_v59 = vld [vmem:[#allocation2 + $0x1d0] sm:$0xff] }
  0x90   :  { %v192_v61 = vmul.f32 %v1096_v10, %v124_v59 }
  0x91   :  { %494 = vmatmul.f32.gmra.mxu2 %v310_v46 }
  0x92   :  { %v260_v4 = vadd.f32 %v1102_v15, %v192_v61 }
  0x97   :  { %401 = vmatmul.f32.gmra.mxu0 %v279_v7  ;;  %449 = vmatmul.f32.gmra.mxu1 %v295_v12  ;;  %v324_v7 = vmax.f32 %v260_v4, 0.0  ;;  %v193_v12 = vmul.f32 %v1096_v10, %v125_v9 }
  0x99   :  { %497 = vmatmul.f32.gmra.mxu2 %v311_v56  ;;  %536 = vmatmul.f32.gmra.mxu3 %v324_v7  ;;  %v261_v19 = vadd.f32 %v1102_v15, %v193_v12  ;;  %v329_v56 = vmax.f32 %v265_v55, 0.0 }
  0x9f   :  { %404 = vmatmul.f32.gmra.mxu0 %v280_v22  ;;  %452 = vmatmul.f32.gmra.mxu1 %v296_v29  ;;  %v325_v22 = vmax.f32 %v261_v19, 0.0  ;;  %v262_v29 = vadd.f32 %v1102_v15, %v194_v24 }
  0xa1   :  { %500 = vmatmul.f32.gmra.mxu2 %v312_v6  ;;  %539 = vmatmul.f32.gmra.mxu3 %v325_v22  ;;  %v326_v31 = vmax.f32 %v262_v29, 0.0 }
  0xa7   :  { %407 = vmatmul.f32.gmra.mxu0 %v281_v39  ;;  %455 = vmatmul.f32.gmra.mxu1 %v297_v43  ;;  %v263_v39 = vadd.f32 %v1102_v15, %v195_v33  ;;  %v196_v43 = vmul.f32 %v1096_v10, %v128_v42 }
  0xa9   :  { %503 = vmatmul.f32.gmra.mxu2 %v313_v21  ;;  %542 = vmatmul.f32.gmra.mxu3 %v326_v31  ;;  %v327_v41 = vmax.f32 %v263_v39, 0.0  ;;  %v264_v47 = vadd.f32 %v1102_v15, %v196_v43 }
  0xab   :  { %v328_v48 = vmax.f32 %v264_v47, 0.0 }
  0xac   :  { %v363_v52 = vpop.f32.mrf.mxu0  ;;  %v1213_v53 = vpop.f32.mrf.mxu1 }
  0xad   :  { %555 = vst [vmem:[#allocation8] sm:$0xff] %v363_v52  ;;  %v689_v0 = vmul.f32 %v363_v52, %v363_v52 }
  0xae   :  { %571 = vst [vmem:[#allocation8 + $0x80] sm:$0xff] %v1213_v53 }
  0xb1   :  { %545 = vmatmul.f32.gmra.mxu3 %v327_v41 }
  0xb4   :  { %v366_v62 = vpop.f32.mrf.mxu0  ;;  %v1220_v63 = vpop.f32.mrf.mxu1 }
  0xb5   :  { %556 = vst [vmem:[#allocation8 + $0x8] sm:$0xff] %v366_v62  ;;  %v619_v1 = vadd.f32 %v366_v62, %v363_v52  ;;  %v690_v2 = vmul.f32 %v366_v62, %v366_v62  ;;  %v1242_v38 = vpop.f32.mrf.mxu2 }
  0xb6   :  { %572 = vst [vmem:[#allocation8 + $0x88] sm:$0xff] %v1220_v63 }
  0xb7   :  { %v753_v5 = vadd.f32 %v690_v2, %v689_v0  ;;  %587 = vst [vmem:[#allocation8 + $0x100] sm:$0xff] %v1242_v38 }
  0xb9   :  { %548 = vmatmul.f32.gmra.mxu3 %v328_v48 }
  0xbc   :  { %v369_v13 = vpop.f32.mrf.mxu0  ;;  %v1227_v14 = vpop.f32.mrf.mxu1 }
  0xbd   :  { %557 = vst [vmem:[#allocation8 + $0x10] sm:$0xff] %v369_v13  ;;  %v620_v16 = vadd.f32 %v619_v1, %v369_v13  ;;  %v691_v17 = vmul.f32 %v369_v13, %v369_v13  ;;  %v1255_v46 = vpop.f32.mrf.mxu2 }
  0xbe   :  { %573 = vst [vmem:[#allocation8 + $0x90] sm:$0xff] %v1227_v14 }
  0xbf   :  { %v754_v20 = vadd.f32 %v753_v5, %v691_v17  ;;  %588 = vst [vmem:[#allocation8 + $0x108] sm:$0xff] %v1255_v46 }
  0xc1   :  { %551 = vmatmul.f32.gmra.mxu3 %v329_v56 }
  0xc4   :  { %v372_v25 = vpop.f32.mrf.mxu0  ;;  %v1233_v26 = vpop.f32.mrf.mxu1 }
  0xc5   :  { %558 = vst [vmem:[#allocation8 + $0x18] sm:$0xff] %v372_v25  ;;  %v621_v27 = vadd.f32 %v620_v16, %v372_v25  ;;  %v692_v28 = vmul.f32 %v372_v25, %v372_v25  ;;  %v1263_v54 = vpop.f32.mrf.mxu2 }
  0xc6   :  { %574 = vst [vmem:[#allocation8 + $0x98] sm:$0xff] %v1233_v26 }
  0xc7   :  { %v755_v30 = vadd.f32 %v754_v20, %v692_v28  ;;  %589 = vst [vmem:[#allocation8 + $0x110] sm:$0xff] %v1263_v54 }
  0xc8   :  { %v1278_v61 = vpop.f32.mrf.mxu3 }
  0xc9   :  { %603 = vst [vmem:[#allocation8 + $0x180] sm:$0xff] %v1278_v61 }
  0xcc   :  { %v375_v34 = vpop.f32.mrf.mxu0  ;;  %v1238_v35 = vpop.f32.mrf.mxu1 }
  0xcd   :  { %559 = vst [vmem:[#allocation8 + $0x20] sm:$0xff] %v375_v34  ;;  %v1240_v36 = vadd.f32 %v621_v27, %v375_v34  ;;  %v693_v37 = vmul.f32 %v375_v34, %v375_v34  ;;  %v1270_v59 = vpop.f32.mrf.mxu2 }
  0xce   :  { %575 = vst [vmem:[#allocation8 + $0xa0] sm:$0xff] %v1238_v35 }
  0xcf   :  { %v1246_v40 = vadd.f32 %v755_v30, %v693_v37  ;;  %590 = vst [vmem:[#allocation8 + $0x118] sm:$0xff] %v1270_v59 }
  0xd0   :  { %v1287_v2 = vpop.f32.mrf.mxu3 }
  0xd1   :  { %604 = vst [vmem:[#allocation8 + $0x188] sm:$0xff] %v1287_v2 }
  0xd4   :  { %v1250_v44 = vpop.f32.mrf.mxu0  ;;  %v1252_v45 = vpop.f32.mrf.mxu1 }
  0xd5   :  { %560 = vst [vmem:[#allocation8 + $0x28] sm:$0xff] %v1250_v44  ;;  %v1276_v15 = vpop.f32.mrf.mxu2  ;;  %v694_v18 = vmul.f32 %v1250_v44, %v1250_v44  ;;  %v623_v19 = vadd.f32 %v1240_v36, %v1250_v44 }
  0xd6   :  { %576 = vst [vmem:[#allocation8 + $0xa8] sm:$0xff] %v1252_v45 }
  0xd7   :  { %591 = vst [vmem:[#allocation8 + $0x120] sm:$0xff] %v1276_v15  ;;  %v757_v21 = vadd.f32 %v1246_v40, %v694_v18 }
  0xd8   :  { %v1296_v6 = vpop.f32.mrf.mxu3 }
  0xd9   :  { %605 = vst [vmem:[#allocation8 + $0x190] sm:$0xff] %v1296_v6 }
  0xdc   :  { %v381_v51 = vpop.f32.mrf.mxu0  ;;  %v1261_v52 = vpop.f32.mrf.mxu1 }
  0xdd   :  { %561 = vst [vmem:[#allocation8 + $0x30] sm:$0xff] %v381_v51  ;;  %v1285_v1 = vpop.f32.mrf.mxu2  ;;  %v695_v20 = vmul.f32 %v381_v51, %v381_v51  ;;  %v624_v22 = vadd.f32 %v623_v19, %v381_v51 }
  0xde   :  { %577 = vst [vmem:[#allocation8 + $0xb0] sm:$0xff] %v1261_v52 }
  0xdf   :  { %592 = vst [vmem:[#allocation8 + $0x128] sm:$0xff] %v1285_v1  ;;  %v758_v27 = vadd.f32 %v757_v21, %v695_v20 }
  0xe0   :  { %v1305_v11 = vpop.f32.mrf.mxu3 }
  0xe1   :  { %606 = vst [vmem:[#allocation8 + $0x198] sm:$0xff] %v1305_v11 }
  0xe4   :  { %v384_v57 = vpop.f32.mrf.mxu0  ;;  %v1268_v58 = vpop.f32.mrf.mxu1 }
  0xe5   :  { %562 = vst [vmem:[#allocation8 + $0x38] sm:$0xff] %v384_v57  ;;  %v1294_v5 = vpop.f32.mrf.mxu2  ;;  %v696_v23 = vmul.f32 %v384_v57, %v384_v57  ;;  %v625_v28 = vadd.f32 %v624_v22, %v384_v57 }
  0xe6   :  { %578 = vst [vmem:[#allocation8 + $0xb8] sm:$0xff] %v1268_v58 }
  0xe7   :  { %593 = vst [vmem:[#allocation8 + $0x130] sm:$0xff] %v1294_v5  ;;  %v759_v32 = vadd.f32 %v758_v27, %v696_v23 }
  0xe8   :  { %v1314_v17 = vpop.f32.mrf.mxu3 }
  0xe9   :  { %607 = vst [vmem:[#allocation8 + $0x1a0] sm:$0xff] %v1314_v17 }
  0xec   :  { %v387_v10 = vpop.f32.mrf.mxu0  ;;  %v1274_v60 = vpop.f32.mrf.mxu1 }
  0xed   :  { %563 = vst [vmem:[#allocation8 + $0x40] sm:$0xff] %v387_v10  ;;  %v1303_v9 = vpop.f32.mrf.mxu2  ;;  %v697_v29 = vmul.f32 %v387_v10, %v387_v10  ;;  %v626_v33 = vadd.f32 %v625_v28, %v387_v10  ;;  %v705_v28 = vmul.f32 %v1213_v53, %v1213_v53 }
  0xee   :  { %579 = vst [vmem:[#allocation8 + $0xc0] sm:$0xff] %v1274_v60 }
  0xef   :  { %594 = vst [vmem:[#allocation8 + $0x138] sm:$0xff] %v1303_v9  ;;  %v760_v36 = vadd.f32 %v759_v32, %v697_v29  ;;  %v706_v32 = vmul.f32 %v1220_v63, %v1220_v63 }
  0xf0   :  { %v1328_v31 = vpop.f32.mrf.mxu3 }
  0xf1   :  { %608 = vst [vmem:[#allocation8 + $0x1a8] sm:$0xff] %v1328_v31 }
  0xf4   :  { %v390_v62 = vpop.f32.mrf.mxu0  ;;  %v1283_v0 = vpop.f32.mrf.mxu1 }
  0xf5   :  { %564 = vst [vmem:[#allocation8 + $0x48] sm:$0xff] %v390_v62  ;;  %v1312_v16 = vpop.f32.mrf.mxu2  ;;  %v698_v34 = vmul.f32 %v390_v62, %v390_v62  ;;  %v627_v37 = vadd.f32 %v626_v33, %v390_v62 }
  0xf6   :  { %580 = vst [vmem:[#allocation8 + $0xc8] sm:$0xff] %v1283_v0 }
  0xf7   :  { %595 = vst [vmem:[#allocation8 + $0x140] sm:$0xff] %v1312_v16  ;;  %v761_v40 = vadd.f32 %v760_v36, %v698_v34  ;;  %v707_v36 = vmul.f32 %v1227_v14, %v1227_v14 }
  0xf8   :  { %v1337_v51 = vpop.f32.mrf.mxu3 }
  0xf9   :  { %609 = vst [vmem:[#allocation8 + $0x1b0] sm:$0xff] %v1337_v51 }
  0xfc   :  { %v393_v3 = vpop.f32.mrf.mxu0  ;;  %v1292_v4 = vpop.f32.mrf.mxu1 }
  0xfd   :  { %565 = vst [vmem:[#allocation8 + $0x50] sm:$0xff] %v393_v3  ;;  %v1326_v30 = vpop.f32.mrf.mxu2  ;;  %v699_v39 = vmul.f32 %v393_v3, %v393_v3  ;;  %v628_v41 = vadd.f32 %v627_v37, %v393_v3 }
  0xfe   :  { %581 = vst [vmem:[#allocation8 + $0xd0] sm:$0xff] %v1292_v4 }
  0xff   :  { %596 = vst [vmem:[#allocation8 + $0x148] sm:$0xff] %v1326_v30  ;;  %v762_v47 = vadd.f32 %v761_v40, %v699_v39 }
 0x104   :  { %v396_v7 = vpop.f32.mrf.mxu0  ;;  %v1301_v8 = vpop.f32.mrf.mxu1 }
 0x105   :  { %566 = vst [vmem:[#allocation8 + $0x58] sm:$0xff] %v396_v7  ;;  %v700_v42 = vmul.f32 %v396_v7, %v396_v7  ;;  %v629_v48 = vadd.f32 %v628_v41, %v396_v7  ;;  %v1335_v50 = vpop.f32.mrf.mxu2 }
 0x106   :  { %582 = vst [vmem:[#allocation8 + $0xd8] sm:$0xff] %v1301_v8 }
 0x107   :  { %v763_v55 = vadd.f32 %v762_v47, %v700_v42  ;;  %597 = vst [vmem:[#allocation8 + $0x150] sm:$0xff] %v1335_v50 }
 0x10c   :  { %v399_v12 = vpop.f32.mrf.mxu0  ;;  %v1310_v13 = vpop.f32.mrf.mxu1 }
 0x10d   :  { %567 = vst [vmem:[#allocation8 + $0x60] sm:$0xff] %v399_v12  ;;  %v701_v49 = vmul.f32 %v399_v12, %v399_v12  ;;  %v630_v56 = vadd.f32 %v629_v48, %v399_v12  ;;  %v1344_v27 = vpop.f32.mrf.mxu2  ;;  %v1346_v12 = vpop.f32.mrf.mxu3 }
 0x10e   :  { %583 = vst [vmem:[#allocation8 + $0xe0] sm:$0xff] %v1310_v13 }
 0x10f   :  { %v764_v10 = vadd.f32 %v763_v55, %v701_v49  ;;  %598 = vst [vmem:[#allocation8 + $0x158] sm:$0xff] %v1344_v27  ;;  %v711_v55 = vmul.f32 %v1261_v52, %v1261_v52 }
 0x110   :  { %610 = vst [vmem:[#allocation8 + $0x1b8] sm:$0xff] %v1346_v12 }
 0x114   :  { %v402_v24 = vpop.f32.mrf.mxu0  ;;  %v1324_v25 = vpop.f32.mrf.mxu1 }
 0x115   :  { %568 = vst [vmem:[#allocation8 + $0x68] sm:$0xff] %v402_v24  ;;  %v702_v57 = vmul.f32 %v402_v24, %v402_v24  ;;  %v631_v62 = vadd.f32 %v630_v56, %v402_v24  ;;  %v1363_v42 = vpop.f32.mrf.mxu2 }
 0x116   :  { %584 = vst [vmem:[#allocation8 + $0xe8] sm:$0xff] %v1324_v25 }
 0x117   :  { %v765_v18 = vadd.f32 %v764_v10, %v702_v57  ;;  %599 = vst [vmem:[#allocation8 + $0x160] sm:$0xff] %v1363_v42  ;;  %v712_v10 = vmul.f32 %v1268_v58, %v1268_v58 }
 0x11c   :  { %v405_v43 = vpop.f32.mrf.mxu0  ;;  %v1333_v44 = vpop.f32.mrf.mxu1 }
 0x11d   :  { %569 = vst [vmem:[#allocation8 + $0x70] sm:$0xff] %v405_v43  ;;  %v703_v3 = vmul.f32 %v405_v43, %v405_v43  ;;  %v632_v7 = vadd.f32 %v631_v62, %v405_v43  ;;  %v1365_v43 = vpop.f32.mrf.mxu3 }
 0x11e   :  { %585 = vst [vmem:[#allocation8 + $0xf0] sm:$0xff] %v1333_v44 }
 0x11f   :  { %v766_v21 = vadd.f32 %v765_v18, %v703_v3  ;;  %611 = vst [vmem:[#allocation8 + $0x1c0] sm:$0xff] %v1365_v43  ;;  %v1381_v3 = vpop.f32.mrf.mxu2 }
 0x120   :  { %600 = vst [vmem:[#allocation8 + $0x168] sm:$0xff] %v1381_v3 }
 0x124   :  { %v408_v19 = vpop.f32.mrf.mxu0  ;;  %v1342_v20 = vpop.f32.mrf.mxu1 }
 0x125   :  { %570 = vst [vmem:[#allocation8 + $0x78] sm:$0xff] %v408_v19  ;;  %v633_v22 = vadd.f32 %v632_v7, %v408_v19  ;;  %v704_v23 = vmul.f32 %v408_v19, %v408_v19  ;;  %v1383_v18 = vpop.f32.mrf.mxu3 }
 0x126   :  { %586 = vst [vmem:[#allocation8 + $0xf8] sm:$0xff] %v1342_v20 }
 0x127   :  { %v634_v24 = vadd.f32 %v633_v22, %v1213_v53  ;;  %v767_v29 = vadd.f32 %v766_v21, %v704_v23  ;;  %v708_v53 = vmul.f32 %v1233_v26, %v1233_v26  ;;  %612 = vst [vmem:[#allocation8 + $0x1c8] sm:$0xff] %v1383_v18  ;;  %v715_v22 = vmul.f32 %v1292_v4, %v1292_v4 }
 0x129   :  { %v635_v33 = vadd.f32 %v634_v24, %v1220_v63  ;;  %v768_v34 = vadd.f32 %v767_v29, %v705_v28  ;;  %v709_v63 = vmul.f32 %v1238_v35, %v1238_v35 }
 0x12b   :  { %v636_v37 = vadd.f32 %v635_v33, %v1227_v14  ;;  %v769_v39 = vadd.f32 %v768_v34, %v706_v32  ;;  %v710_v14 = vmul.f32 %v1252_v45, %v1252_v45  ;;  %v1399_v32 = vpop.f32.mrf.mxu2 }
 0x12c   :  { %601 = vst [vmem:[#allocation8 + $0x170] sm:$0xff] %v1399_v32 }
 0x12d   :  { %v637_v40 = vadd.f32 %v636_v37, %v1233_v26  ;;  %v770_v41 = vadd.f32 %v769_v39, %v707_v36  ;;  %v1401_v33 = vpop.f32.mrf.mxu3  ;;  %v717_v36 = vmul.f32 %v1310_v13, %v1310_v13 }
 0x12e   :  { %613 = vst [vmem:[#allocation8 + $0x1d0] sm:$0xff] %v1401_v33 }
 0x12f   :  { %v638_v47 = vadd.f32 %v637_v40, %v1238_v35  ;;  %v771_v48 = vadd.f32 %v770_v41, %v708_v53  ;;  %v719_v40 = vmul.f32 %v1333_v44, %v1333_v44  ;;  %v720_v41 = vmul.f32 %v1342_v20, %v1342_v20 }
 0x131   :  { %v639_v26 = vadd.f32 %v638_v47, %v1252_v45  ;;  %v772_v49 = vadd.f32 %v771_v48, %v709_v63  ;;  %v713_v45 = vmul.f32 %v1274_v60, %v1274_v60 }
 0x133   :  { %v773_v56 = vadd.f32 %v772_v49, %v710_v14  ;;  %v640_v57 = vadd.f32 %v639_v26, %v1261_v52  ;;  %v714_v52 = vmul.f32 %v1283_v0, %v1283_v0  ;;  %v504_v47 = vpop.f32.mrf.mxu2  ;;  %v721_v14 = vmul.f32 %v1242_v38, %v1242_v38 }
 0x134   :  { %602 = vst [vmem:[#allocation8 + $0x178] sm:$0xff] %v504_v47 }
 0x135   :  { %v641_v35 = vadd.f32 %v640_v57, %v1268_v58  ;;  %v774_v62 = vadd.f32 %v773_v56, %v711_v55  ;;  %v1417_v48 = vpop.f32.mrf.mxu3 }
 0x136   :  { %614 = vst [vmem:[#allocation8 + $0x1d8] sm:$0xff] %v1417_v48 }
 0x137   :  { %v642_v7 = vadd.f32 %v641_v35, %v1274_v60  ;;  %v775_v19 = vadd.f32 %v774_v62, %v712_v10  ;;  %v716_v60 = vmul.f32 %v1301_v8, %v1301_v8  ;;  %v724_v10 = vmul.f32 %v1270_v59, %v1270_v59 }
 0x139   :  { %v643_v58 = vadd.f32 %v642_v7, %v1283_v0  ;;  %v776_v21 = vadd.f32 %v775_v19, %v713_v45 }
 0x13b   :  { %v644_v23 = vadd.f32 %v643_v58, %v1292_v4  ;;  %v777_v28 = vadd.f32 %v776_v21, %v714_v52 }
 0x13d   :  { %v645_v24 = vadd.f32 %v644_v23, %v1301_v8  ;;  %v778_v29 = vadd.f32 %v777_v28, %v715_v22  ;;  %v718_v8 = vmul.f32 %v1324_v25, %v1324_v25  ;;  %v1432_v62 = vpop.f32.mrf.mxu3  ;;  %v728_v22 = vmul.f32 %v1303_v9, %v1303_v9 }
 0x13e   :  { %615 = vst [vmem:[#allocation8 + $0x1e0] sm:$0xff] %v1432_v62 }
 0x13f   :  { %v779_v0 = vadd.f32 %v778_v29, %v716_v60  ;;  %v646_v34 = vadd.f32 %v645_v24, %v1310_v13  ;;  %v730_v29 = vmul.f32 %v1326_v30, %v1326_v30 }
 0x141   :  { %v780_v4 = vadd.f32 %v779_v0, %v717_v36  ;;  %v647_v37 = vadd.f32 %v646_v34, %v1324_v25 }
 0x143   :  { %v781_v39 = vadd.f32 %v780_v4, %v718_v8  ;;  %v648_v53 = vadd.f32 %v647_v37, %v1333_v44  ;;  %v722_v44 = vmul.f32 %v1255_v46, %v1255_v46  ;;  %v732_v37 = vmul.f32 %v1344_v27, %v1344_v27 }
 0x145   :  { %v782_v63 = vadd.f32 %v781_v39, %v719_v40  ;;  %v649_v13 = vadd.f32 %v648_v53, %v1342_v20  ;;  %v723_v20 = vmul.f32 %v1263_v54, %v1263_v54  ;;  %v733_v53 = vmul.f32 %v1363_v42, %v1363_v42 }
 0x147   :  { %v650_v25 = vadd.f32 %v649_v13, %v1242_v38  ;;  %v783_v26 = vadd.f32 %v782_v63, %v720_v41  ;;  %v734_v41 = vmul.f32 %v1381_v3, %v1381_v3  ;;  %v735_v13 = vmul.f32 %v1399_v32, %v1399_v32 }
 0x149   :  { %v651_v49 = vadd.f32 %v650_v25, %v1255_v46  ;;  %v784_v55 = vadd.f32 %v783_v26, %v721_v14  ;;  %v725_v46 = vmul.f32 %v1276_v15, %v1276_v15  ;;  %v736_v14 = vmul.f32 %v504_v47, %v504_v47 }
 0x14b   :  { %v652_v56 = vadd.f32 %v651_v49, %v1263_v54  ;;  %v785_v57 = vadd.f32 %v784_v55, %v722_v44  ;;  %v726_v54 = vmul.f32 %v1285_v1, %v1285_v1 }
 0x14d   :  { %v653_v38 = vadd.f32 %v652_v56, %v1270_v59  ;;  %v786_v35 = vadd.f32 %v785_v57, %v723_v20  ;;  %v727_v59 = vmul.f32 %v1294_v5, %v1294_v5 }
 0x14f   :  { %v654_v45 = vadd.f32 %v653_v38, %v1276_v15  ;;  %v787_v7 = vadd.f32 %v786_v35, %v724_v10  ;;  %v1447_v15 = vpop.f32.mrf.mxu3  ;;  %v741_v35 = vmul.f32 %v1314_v17, %v1314_v17 }
 0x150   :  { %616 = vst [vmem:[#allocation8 + $0x1e8] sm:$0xff] %v1447_v15 }
 0x151   :  { %v655_v19 = vadd.f32 %v654_v45, %v1285_v1  ;;  %v788_v52 = vadd.f32 %v787_v7, %v725_v46  ;;  %v729_v1 = vmul.f32 %v1312_v16, %v1312_v16 }
 0x153   :  { %v789_v58 = vadd.f32 %v788_v52, %v726_v54  ;;  %v656_v21 = vadd.f32 %v655_v19, %v1294_v5 }
 0x155   :  { %v657_v23 = vadd.f32 %v656_v21, %v1303_v9  ;;  %v790_v28 = vadd.f32 %v789_v58, %v727_v59  ;;  %v731_v9 = vmul.f32 %v1335_v50, %v1335_v50 }
 0x157   :  { %v658_v24 = vadd.f32 %v657_v23, %v1312_v16  ;;  %v791_v60 = vadd.f32 %v790_v28, %v728_v22  ;;  %v1462_v16 = vpop.f32.mrf.mxu3 }
 0x158   :  { %617 = vst [vmem:[#allocation8 + $0x1f0] sm:$0xff] %v1462_v16 }
 0x159   :  { %v659_v5 = vadd.f32 %v658_v24, %v1326_v30  ;;  %v792_v0 = vadd.f32 %v791_v60, %v729_v1  ;;  %v748_v60 = vmul.f32 %v1417_v48, %v1417_v48 }
 0x15b   :  { %v660_v34 = vadd.f32 %v659_v5, %v1335_v50  ;;  %v793_v36 = vadd.f32 %v792_v0, %v730_v29  ;;  %v749_v0 = vmul.f32 %v1432_v62, %v1432_v62 }
 0x15d   :  { %v661_v4 = vadd.f32 %v660_v34, %v1344_v27  ;;  %v794_v8 = vadd.f32 %v793_v36, %v731_v9  ;;  %v750_v34 = vmul.f32 %v1447_v15, %v1447_v15 }
 0x15f   :  { %v795_v39 = vadd.f32 %v794_v8, %v732_v37  ;;  %v662_v30 = vadd.f32 %v661_v4, %v1363_v42  ;;  %v552_v26 = vpop.f32.mrf.mxu3  ;;  %v751_v4 = vmul.f32 %v1462_v16, %v1462_v16 }
 0x160   :  { %618 = vst [vmem:[#allocation8 + $0x1f8] sm:$0xff] %v552_v26 }
 0x161   :  { %v796_v40 = vadd.f32 %v795_v39, %v733_v53  ;;  %v663_v50 = vadd.f32 %v662_v30, %v1381_v3  ;;  %v737_v3 = vmul.f32 %v1278_v61, %v1278_v61  ;;  %835 = dma.vmem_to_hbm [thread:$0]  %s828_s9, 8192, %s830_s12, [#allocation4], %s1046_s28, %s1046_s28, %s1047_s29  }
 0x163   :  { %v797_v27 = vadd.f32 %v796_v40, %v734_v41  ;;  %v664_v63 = vadd.f32 %v663_v50, %v1399_v32  ;;  %v738_v32 = vmul.f32 %v1287_v2, %v1287_v2 }
 0x165   :  { %v798_v42 = vadd.f32 %v797_v27, %v735_v13  ;;  %v665_v25 = vadd.f32 %v664_v63, %v504_v47  ;;  %v739_v47 = vmul.f32 %v1296_v6, %v1296_v6 }
 0x167   :  { %v666_v44 = vadd.f32 %v665_v25, %v1278_v61  ;;  %v799_v49 = vadd.f32 %v798_v42, %v736_v14  ;;  %v740_v61 = vmul.f32 %v1305_v11, %v1305_v11 }
 0x169   :  { %v667_v55 = vadd.f32 %v666_v44, %v1287_v2  ;;  %v800_v20 = vadd.f32 %v799_v49, %v737_v3  ;;  %v742_v2 = vmul.f32 %v1328_v31, %v1328_v31 }
 0x16b   :  { %v668_v56 = vadd.f32 %v667_v55, %v1296_v6  ;;  %v801_v57 = vadd.f32 %v800_v20, %v738_v32  ;;  %v743_v6 = vmul.f32 %v1337_v51, %v1337_v51 }
 0x16d   :  { %v669_v10 = vadd.f32 %v668_v56, %v1305_v11  ;;  %v802_v38 = vadd.f32 %v801_v57, %v739_v47  ;;  %v744_v11 = vmul.f32 %v1346_v12, %v1346_v12 }
 0x16f   :  { %v670_v46 = vadd.f32 %v669_v10, %v1314_v17  ;;  %v803_v45 = vadd.f32 %v802_v38, %v740_v61  ;;  %v745_v17 = vmul.f32 %v1365_v43, %v1365_v43 }
 0x171   :  { %v671_v7 = vadd.f32 %v670_v46, %v1328_v31  ;;  %v804_v54 = vadd.f32 %v803_v45, %v741_v35  ;;  %v746_v31 = vmul.f32 %v1383_v18, %v1383_v18 }
 0x173   :  { %v805_v19 = vadd.f32 %v804_v54, %v742_v2  ;;  %v672_v52 = vadd.f32 %v671_v7, %v1337_v51  ;;  %v747_v51 = vmul.f32 %v1401_v33, %v1401_v33 }
 0x175   :  { %v673_v59 = vadd.f32 %v672_v52, %v1346_v12  ;;  %v806_v58 = vadd.f32 %v805_v19, %v743_v6 }
 0x177   :  { %v674_v21 = vadd.f32 %v673_v59, %v1365_v43  ;;  %v807_v22 = vadd.f32 %v806_v58, %v744_v11 }
 0x179   :  { %v675_v23 = vadd.f32 %v674_v21, %v1383_v18  ;;  %v808_v28 = vadd.f32 %v807_v22, %v745_v17 }
 0x17b   :  { %v676_v1 = vadd.f32 %v675_v23, %v1401_v33  ;;  %v809_v24 = vadd.f32 %v808_v28, %v746_v31 }
 0x17d   :  { %v677_v12 = vadd.f32 %v676_v1, %v1417_v48  ;;  %v810_v29 = vadd.f32 %v809_v24, %v747_v51  ;;  %v752_v48 = vmul.f32 %v552_v26, %v552_v26 }
 0x17f   :  { %v811_v43 = vadd.f32 %v810_v29, %v748_v60  ;;  %v678_v5 = vadd.f32 %v677_v12, %v1432_v62 }
 0x181   :  { %v812_v18 = vadd.f32 %v811_v43, %v749_v0  ;;  %v679_v9 = vadd.f32 %v678_v5, %v1447_v15 }
 0x183   :  { %v813_v33 = vadd.f32 %v812_v18, %v750_v34  ;;  %v680_v36 = vadd.f32 %v679_v9, %v1462_v16 }
 0x185   :  { %v814_v37 = vadd.f32 %v813_v33, %v751_v4  ;;  %v681_v8 = vadd.f32 %v680_v36, %v552_v26 }
 0x187   :  { %v682_v39 = vrot.slane %v681_v8, 4  ;;  %v815_v30 = vadd.f32 %v814_v37, %v752_v48 }
 0x189   :  { %v683_v53 = vadd.f32 %v682_v39, %v681_v8  ;;  %v816_v40 = vrot.slane %v815_v30, 4 }
 0x18b   :  { %v684_v62 = vrot.slane %v683_v53, 2  ;;  %v817_v50 = vadd.f32 %v816_v40, %v815_v30 }
 0x18d   :  { %v685_v41 = vadd.f32 %v684_v62, %v683_v53  ;;  %v818_v27 = vrot.slane %v817_v50, 2 }
 0x18f   :  { %v686_v63 = vrot.slane %v685_v41, 1  ;;  %v819_v13 = vadd.f32 %v818_v27, %v817_v50 }
 0x191   :  { %v687_v15 = vadd.f32 %v686_v63, %v685_v41  ;;  %v820_v16 = vrot.slane %v819_v13, 1 }
 0x193   :  { %688 = vst [vmem:[#allocation9] sm:$0x1] %v687_v15  ;;  %v821_v14 = vadd.f32 %v820_v16, %v819_v13 }
 0x195   :  { %822 = vst [vmem:[#allocation9 + $0x1] sm:$0x1] %v821_v14 }
 0x196   :  { %846 = dma.vmem_to_hbm [thread:$0]  %s842_s13, 32, %s844_s16, [#allocation10]  }
 0x197   :  { %1040 = dma.done.wait [#allocation4], 8192  }
 0x198   :  { %1041 = vsyncadd [#allocation4], 4294959104 }
 0x199   :  { %1042 = dma.done.wait [#allocation10], 32  }
 0x19a   :  { %1043 = vsyncadd [#allocation10], 4294967264 }
 0x19b   :  { %855 = vsyncpa [#allocation3], 1 }
 0x19c   :  { %856 = vsyncpa [#allocation6], 1 }
 0x19d   :  { %857 = vsyncpa [#allocation4], 1 }
 0x19e   :  { %858 = vsyncpa [#allocation10], 1 }

</bundles_post_ra>
